<compile_context>
chip_gen: v7x
topology: tpu7x:2x2x1
jax: 0.10.0
libtpu: 0.0.40
codegen_flags: <defaults>
</compile_context>

<pallas_src>
import functools

import jax
import jax.numpy as jnp
from jax.experimental import pallas as pl
from jax.experimental.pallas import tpu as pltpu


def _round_up(x, m):
    return ((x + m - 1) // m) * m


def adapter_kernel(view_scale, residual_scale,
                   feat_ref, w1_ref, b1_ref, w2_ref, b2_ref, w3_ref, b3_ref,
                   out_ref):
    """One batch-tile of the folded Adapter forward.

    feat_ref : (TB, VCp)    flattened per-view features (== res_feat), f32 or bf16
    w1/b1    : (VCp, C)/(1,C)  Linear(V*C->C) with fusion_ratio, BN1, BN2 folded in
    w2/b2    : (C, C)  /(1,C)  view_f Linear(C->C)
    w3/b3    : (C, VCp)/(1,VCp) view_f Linear(C->V*C), adapter_ratio folded in (r > 0)
    out_ref  : (TB, VCp)    f32
    """
    x = feat_ref[...]
    # Residual / elementwise path stays in f32 vregs (v5e has no bf16 VALU path).
    x_f32 = x.astype(jnp.float32)

    # global_f (fusion scale + BatchNormPoint + Linear + BatchNorm1d, all folded) + ReLU
    g = jnp.dot(x, w1_ref[...], preferred_element_type=jnp.float32) + b1_ref[...]
    g = jnp.maximum(g, 0.0)

    # view_f: Linear(C->C) -> ReLU -> Linear(C->V*C) -> ReLU
    h = jnp.dot(g.astype(w2_ref.dtype), w2_ref[...],
                preferred_element_type=jnp.float32) + b2_ref[...]
    h = jnp.maximum(h, 0.0)
    v = jnp.dot(h.astype(w3_ref.dtype), w3_ref[...],
                preferred_element_type=jnp.float32) + b3_ref[...]
    v = jnp.maximum(v, 0.0)

    if view_scale != 1.0:            # only taken when adapter_ratio could not be folded
        v = v * view_scale

    # residual fusion: view_feat * ratio + res_feat * (1 - ratio)
    out_ref[...] = (v + x_f32 * residual_scale).astype(out_ref.dtype)


def _vmem_capacity_bytes():
    """Per-TensorCore VMEM, with a conservative (v7x: 64 MiB) fallback."""
    try:
        info = pltpu.get_tpu_info()
        cap = getattr(info, "vmem_capacity_bytes", None)
        if cap:
            return int(cap)
    except Exception:
        pass
    return 64 * 1024 * 1024


def _choose_batch_tile(batch_rows, row_bytes_pipelined, weight_bytes, vmem_capacity):
    """Pick a sublane-aligned batch tile, the padded batch size, and a VMEM limit.

    row_bytes_pipelined : bytes per row of the double-buffered feat + out tiles.
    weight_bytes        : single-buffered (Buffered(1)) grid-invariant operand bytes.
    """
    bp = _round_up(max(batch_rows, 1), 8)

    # Per-generation VMEM budget: ~48 MiB on v7x (64 MiB physical), up to ~96-100 MiB
    # on v5e/v6e (128 MiB physical).
    budget = min(int(vmem_capacity * 0.75), 100 * 1024 * 1024)
    max_tb = (budget - weight_bytes) // max(row_bytes_pipelined, 1)
    max_tb = max(8, min(1024, (max_tb // 8) * 8))   # >1024 rows is past the roofline knee

    MIN_TB = 128        # keep MXU M-dim filled and per-step (~0.35us) overhead amortized
    TARGET_STEPS = 8    # >= 4 pipelined steps per TensorCore even on 2-TC (v7x) chips

    tb = min(max_tb, bp)
    if bp >= TARGET_STEPS * MIN_TB:
        tb = min(tb, _round_up(pl.cdiv(bp, TARGET_STEPS), 8))
        tb = max(tb, MIN_TB)
    elif bp >= 2 * MIN_TB:
        # medium batch: at least 2 steps of DMA/compute overlap, each >= MIN_TB rows
        tb = min(tb, _round_up(pl.cdiv(bp, 2), 8))
        tb = max(tb, MIN_TB)
    # small batch: single step covering everything (tb == bp)
    tb = min(tb, max_tb)          # never exceed the VMEM-derived cap
    tb = max(tb, 8)

    padded = _round_up(bp, tb)
    # Leave room for the non-Buffered(1) fallback (2x weights) but stay under physical VMEM.
    vmem_limit = min(int(vmem_capacity * 0.9), budget + weight_bytes)
    return tb, padded, int(vmem_limit)


def adapter_forward(feat, params, *, num_views, in_features, adapter_ratio,
                    use_bf16=False):
    """feat: (B*V, C) float32.  Returns (B, V*C) float32 (same as the PyTorch module)."""
    V, C = num_views, in_features
    VC = V * C
    VCp = _round_up(VC, 128)       # lane-dense last dim -> unmasked vst on writeback
    eps = 1e-5

    B = feat.shape[0] // V
    x2d = feat.reshape(B, VC).astype(jnp.float32)

    # ---- fold BN / fusion_ratio / adapter_ratio into the Linear weights (glue) ----
    s1 = params["bn1_gamma"] / jnp.sqrt(params["bn1_var"] + eps)      # (C,)
    t1 = params["bn1_beta"] - params["bn1_mean"] * s1                 # (C,)
    s2 = params["bn2_gamma"] / jnp.sqrt(params["bn2_var"] + eps)      # (C,)
    t2 = params["bn2_beta"] - params["bn2_mean"] * s2                 # (C,)

    fuse_vc = jnp.repeat(params["fusion_ratio"], C)                   # (VC,) per-view scale
    s1_vc = jnp.tile(s1, V)                                           # (VC,)
    t1_vc = jnp.tile(t1, V)                                           # (VC,)

    w1t = params["w1"].T                                              # (VC, C)
    d_in = fuse_vc * s1_vc                                            # input-side fold
    w1f = (d_in[:, None] * w1t) * s2[None, :]                         # (VC, C)
    b1f = ((t1_vc @ w1t + params["b1"]) * s2 + t2).reshape(1, C)      # (1, C)

    w2t = params["w2"].T                                              # (C, C)
    b2v = params["b2"].reshape(1, C)

    w3t = params["w3"].T                                              # (C, VC)
    b3v = params["b3"].reshape(1, VC)
    r = float(adapter_ratio)
    if r > 0.0:
        # relu(z) * r == relu(z * r) for r > 0  ->  fold the adapter ratio into W3/b3
        w3t = w3t * r
        b3v = b3v * r
        view_scale = 1.0
    else:
        view_scale = r
    residual_scale = 1.0 - r

    # ---- pad the V*C axis to a multiple of 128 (padded columns stay exactly zero) ----
    if VCp != VC:
        x2d = jnp.pad(x2d, ((0, 0), (0, VCp - VC)))
        w1f = jnp.pad(w1f, ((0, VCp - VC), (0, 0)))
        w3t = jnp.pad(w3t, ((0, 0), (0, VCp - VC)))
        b3v = jnp.pad(b3v, ((0, 0), (0, VCp - VC)))

    # ---- dtype selection: bf16 matmul operands halve HBM traffic on v6e/v7x ----
    mm_dtype = jnp.bfloat16 if use_bf16 else jnp.float32
    out_dtype = jnp.float32
    x2d = x2d.astype(mm_dtype)
    w1f = w1f.astype(mm_dtype)
    w2t = w2t.astype(mm_dtype)
    w3t = w3t.astype(mm_dtype)
    b1f = b1f.astype(jnp.float32)
    b2v = b2v.astype(jnp.float32)
    b3v = b3v.astype(jnp.float32)

    in_item = jnp.dtype(mm_dtype).itemsize
    out_item = jnp.dtype(out_dtype).itemsize
    weight_bytes = (VCp * C + C * C + C * VCp) * in_item + (2 * C + VCp) * 4
    row_bytes = VCp * (2 * in_item + 2 * out_item)     # double-buffered feat + out tiles

    tb, padded_b, vmem_limit = _choose_batch_tile(B, row_bytes, weight_bytes,
                                                  _vmem_capacity_bytes())
    if padded_b != B:
        x2d = jnp.pad(x2d, ((0, padded_b - B), (0, 0)))
    grid = (padded_b // tb,)

    kernel = functools.partial(adapter_kernel, view_scale, residual_scale)

    cost = pl.CostEstimate(
        flops=2 * padded_b * (VCp * C + C * C + C * VCp),
        transcendentals=0,
        bytes_accessed=(padded_b * VCp * (in_item + out_item)
                        + (VCp * C + C * C + C * VCp) * in_item
                        + (2 * C + VCp) * 4),
    )

    # In-place residual update: feat tile is read before its (aliased) output tile is written.
    aliases = {0: 0} if jnp.dtype(mm_dtype) == jnp.dtype(out_dtype) else {}

    def _run(buffered_weights):
        # Grid-invariant operands only ever need one VMEM buffer.
        wkw = {"pipeline_mode": pl.Buffered(1)} if buffered_weights else {}
        const = lambda i: (0, 0)
        call = pl.pallas_call(
            kernel,
            out_shape=jax.ShapeDtypeStruct((padded_b, VCp), out_dtype),
            grid=grid,
            in_specs=[
                pl.BlockSpec((tb, VCp), lambda i: (i, 0)),         # feat tile
                pl.BlockSpec((VCp, C), const, **wkw),              # w1 (fusion+BN folded)
                pl.BlockSpec((1, C), const, **wkw),                # b1 (folded)
                pl.BlockSpec((C, C), const, **wkw),                # w2
                pl.BlockSpec((1, C), const, **wkw),                # b2
                pl.BlockSpec((C, VCp), const, **wkw),              # w3 (ratio folded)
                pl.BlockSpec((1, VCp), const, **wkw),              # b3 (ratio folded)
            ],
            out_specs=pl.BlockSpec((tb, VCp), lambda i: (i, 0)),
            compiler_params=pltpu.CompilerParams(
                dimension_semantics=("parallel",),
                vmem_limit_bytes=vmem_limit),
            cost_estimate=cost,
            input_output_aliases=aliases,
        )
        return call(x2d, w1f, b1f, w2t, b2v, w3t, b3v)

    try:
        out = _run(buffered_weights=True)
    except Exception:
        # Defensive fallback if this JAX build rejects pipeline_mode=pl.Buffered(1).
        out = _run(buffered_weights=False)

    return out[:B, :VC]


def adapter_reference(feat, params, *, num_views, in_features, adapter_ratio):
    """Pure-JAX mirror of the PyTorch forward (eval mode) for verification."""
    V, C = num_views, in_features
    eps = 1e-5
    B = feat.shape[0] // V

    img = feat.reshape(B, V, C) * params["fusion_ratio"].reshape(1, V, 1)
    x = img.reshape(B * V, C)
    x = (x - params["bn1_mean"]) / jnp.sqrt(params["bn1_var"] + eps) \
        * params["bn1_gamma"] + params["bn1_beta"]
    x = x.reshape(B, V * C)
    g = x @ params["w1"].T + params["b1"]
    g = (g - params["bn2_mean"]) / jnp.sqrt(params["bn2_var"] + eps) \
        * params["bn2_gamma"] + params["bn2_beta"]
    g = jnp.maximum(g, 0.0)
    h = jnp.maximum(g @ params["w2"].T + params["b2"], 0.0)
    v = jnp.maximum(h @ params["w3"].T + params["b3"], 0.0)
    res = feat.reshape(B, V * C)
    return v * adapter_ratio + res * (1.0 - adapter_ratio)


def _make_params(key, V, C, fusion_init):
    VC = V * C
    keys = jax.random.split(key, 16)
    return {
        "fusion_ratio": jnp.full((V,), fusion_init, jnp.float32),
        # BatchNormPoint -> BatchNorm1d(C) running stats / affine
        "bn1_gamma": 1.0 + 0.1 * jax.random.normal(keys[0], (C,), jnp.float32),
        "bn1_beta": 0.1 * jax.random.normal(keys[1], (C,), jnp.float32),
        "bn1_mean": 0.1 * jax.random.normal(keys[2], (C,), jnp.float32),
        "bn1_var": jnp.abs(jax.random.normal(keys[3], (C,), jnp.float32)) + 0.5,
        # Linear(V*C -> C)
        "w1": 0.05 * jax.random.normal(keys[4], (C, VC), jnp.float32),
        "b1": 0.05 * jax.random.normal(keys[5], (C,), jnp.float32),
        # BatchNorm1d(C)
        "bn2_gamma": 1.0 + 0.1 * jax.random.normal(keys[6], (C,), jnp.float32),
        "bn2_beta": 0.1 * jax.random.normal(keys[7], (C,), jnp.float32),
        "bn2_mean": 0.1 * jax.random.normal(keys[8], (C,), jnp.float32),
        "bn2_var": jnp.abs(jax.random.normal(keys[9], (C,), jnp.float32)) + 0.5,
        # view_f Linear(C -> C), Linear(C -> V*C)
        "w2": 0.05 * jax.random.normal(keys[10], (C, C), jnp.float32),
        "b2": 0.05 * jax.random.normal(keys[11], (C,), jnp.float32),
        "w3": 0.05 * jax.random.normal(keys[12], (VC, C), jnp.float32),
        "b3": 0.05 * jax.random.normal(keys[13], (VC,), jnp.float32),
    }


if __name__ == "__main__":
    ADAPTER_RATIO = 0.6    # cfg.MODEL.ADAPTER.RATIO
    FUSION_INIT = 0.5      # cfg.MODEL.ADAPTER.INIT

    key = jax.random.PRNGKey(0)
    k1, k2, k3, k4 = jax.random.split(key, 4)

    # --- Config A: V*C = 128 (already lane-dense), f32 and bf16 paths -----------------
    V, C, B = 4, 32, 8
    params = _make_params(k1, V, C, FUSION_INIT)
    feat = jax.random.normal(k2, (B * V, C), jnp.float32)
    ref = adapter_reference(feat, params, num_views=V, in_features=C,
                            adapter_ratio=ADAPTER_RATIO)

    out_f32 = jax.block_until_ready(
        adapter_forward(feat, params, num_views=V, in_features=C,
                        adapter_ratio=ADAPTER_RATIO, use_bf16=False))
    assert out_f32.shape == (B, V * C)
    assert jnp.allclose(out_f32, ref, rtol=2e-3, atol=2e-3), \
        f"f32 max abs err {jnp.max(jnp.abs(out_f32 - ref))}"

    out_bf16 = jax.block_until_ready(
        adapter_forward(feat, params, num_views=V, in_features=C,
                        adapter_ratio=ADAPTER_RATIO, use_bf16=True))
    assert jnp.allclose(out_bf16, ref, rtol=2e-2, atol=2e-2), \
        f"bf16 max abs err {jnp.max(jnp.abs(out_bf16 - ref))}"

    # --- Config B: V*C = 192 -> lane-padded to 256, batch padded 10 -> 16 --------------
    V2, C2, B2 = 6, 32, 10
    params2 = _make_params(k3, V2, C2, FUSION_INIT)
    feat2 = jax.random.normal(k4, (B2 * V2, C2), jnp.float32)
    ref2 = adapter_reference(feat2, params2, num_views=V2, in_features=C2,
                             adapter_ratio=ADAPTER_RATIO)

    out2 = jax.block_until_ready(
        adapter_forward(feat2, params2, num_views=V2, in_features=C2,
                        adapter_ratio=ADAPTER_RATIO, use_bf16=False))
    assert out2.shape == (B2, V2 * C2)
    assert jnp.allclose(out2, ref2, rtol=2e-3, atol=2e-3), \
        f"cfgB max abs err {jnp.max(jnp.abs(out2 - ref2))}"

    print("KERNEL_OK")
</pallas_src>

<mosaic_0001>
module attributes {stable_mosaic.version = 11 : i64} {
  func.func @adapter_kernel(%arg0: i32, %arg1: memref<8x128xf32, #tpu.memory_space<vmem>>, %arg2: memref<128x32xf32, #tpu.memory_space<vmem>>, %arg3: memref<1x32xf32, #tpu.memory_space<vmem>>, %arg4: memref<32x32xf32, #tpu.memory_space<vmem>>, %arg5: memref<1x32xf32, #tpu.memory_space<vmem>>, %arg6: memref<32x128xf32, #tpu.memory_space<vmem>>, %arg7: memref<1x128xf32, #tpu.memory_space<vmem>>, %arg8: memref<8x128xf32, #tpu.memory_space<vmem>>) attributes {dimension_semantics = [#tpu.dimension_semantics<parallel>], iteration_bounds = array<i64: 1>, scalar_prefetch = 0 : i64, scratch_operands = 0 : i64, tpu.core_type = #tpu.core_type<tc>, window_params = [{transform_indices = @transform_0, window_bounds = array<i64: 8, 128>}, {pipeline_mode = #tpu.pipeline_mode<synchronous>, transform_indices = @transform_1, window_bounds = array<i64: 128, 32>}, {pipeline_mode = #tpu.pipeline_mode<synchronous>, transform_indices = @transform_2, window_bounds = array<i64: 1, 32>}, {pipeline_mode = #tpu.pipeline_mode<synchronous>, transform_indices = @transform_3, window_bounds = array<i64: 32, 32>}, {pipeline_mode = #tpu.pipeline_mode<synchronous>, transform_indices = @transform_4, window_bounds = array<i64: 1, 32>}, {pipeline_mode = #tpu.pipeline_mode<synchronous>, transform_indices = @transform_5, window_bounds = array<i64: 32, 128>}, {pipeline_mode = #tpu.pipeline_mode<synchronous>, transform_indices = @transform_6, window_bounds = array<i64: 1, 128>}, {transform_indices = @transform_7, window_bounds = array<i64: 8, 128>}]} {
    %c0 = arith.constant 0 : index
    %c0_0 = arith.constant 0 : index
    %0 = vector.load %arg1[%c0, %c0_0] : memref<8x128xf32, #tpu.memory_space<vmem>>, vector<8x128xf32>
    %c0_1 = arith.constant 0 : index
    %c0_2 = arith.constant 0 : index
    %1 = vector.load %arg2[%c0_1, %c0_2] : memref<128x32xf32, #tpu.memory_space<vmem>>, vector<128x32xf32>
    %cst = arith.constant dense<0.000000e+00> : vector<8x32xf32>
    %2 = tpu.matmul %0, %1, %cst {dimension_numbers = #tpu.dot_dimension_numbers<[1], [0], [0], [1], [0, 0, 1, 1], [], []>} : vector<8x128xf32>, vector<128x32xf32>, vector<8x32xf32> -> vector<8x32xf32>
    %c0_3 = arith.constant 0 : index
    %c0_4 = arith.constant 0 : index
    %3 = vector.load %arg3[%c0_3, %c0_4] : memref<1x32xf32, #tpu.memory_space<vmem>>, vector<1x32xf32>
    %4 = vector.broadcast %3 : vector<1x32xf32> to vector<8x32xf32>
    %5 = arith.addf %2, %4 : vector<8x32xf32>
    %cst_5 = arith.constant 0.000000e+00 : f32
    %6 = vector.broadcast %cst_5 : f32 to vector<8x32xf32>
    %7 = arith.maximumf %5, %6 : vector<8x32xf32>
    %c0_6 = arith.constant 0 : index
    %c0_7 = arith.constant 0 : index
    %8 = vector.load %arg4[%c0_6, %c0_7] : memref<32x32xf32, #tpu.memory_space<vmem>>, vector<32x32xf32>
    %cst_8 = arith.constant dense<0.000000e+00> : vector<8x32xf32>
    %9 = tpu.matmul %7, %8, %cst_8 {dimension_numbers = #tpu.dot_dimension_numbers<[1], [0], [0], [1], [0, 0, 1, 1], [], []>} : vector<8x32xf32>, vector<32x32xf32>, vector<8x32xf32> -> vector<8x32xf32>
    %c0_9 = arith.constant 0 : index
    %c0_10 = arith.constant 0 : index
    %10 = vector.load %arg5[%c0_9, %c0_10] : memref<1x32xf32, #tpu.memory_space<vmem>>, vector<1x32xf32>
    %11 = vector.broadcast %10 : vector<1x32xf32> to vector<8x32xf32>
    %12 = arith.addf %9, %11 : vector<8x32xf32>
    %cst_11 = arith.constant 0.000000e+00 : f32
    %13 = vector.broadcast %cst_11 : f32 to vector<8x32xf32>
    %14 = arith.maximumf %12, %13 : vector<8x32xf32>
    %c0_12 = arith.constant 0 : index
    %c0_13 = arith.constant 0 : index
    %15 = vector.load %arg6[%c0_12, %c0_13] : memref<32x128xf32, #tpu.memory_space<vmem>>, vector<32x128xf32>
    %cst_14 = arith.constant dense<0.000000e+00> : vector<8x128xf32>
    %16 = tpu.matmul %14, %15, %cst_14 {dimension_numbers = #tpu.dot_dimension_numbers<[1], [0], [0], [1], [0, 0, 1, 1], [], []>} : vector<8x32xf32>, vector<32x128xf32>, vector<8x128xf32> -> vector<8x128xf32>
    %c0_15 = arith.constant 0 : index
    %c0_16 = arith.constant 0 : index
    %17 = vector.load %arg7[%c0_15, %c0_16] : memref<1x128xf32, #tpu.memory_space<vmem>>, vector<1x128xf32>
    %18 = vector.broadcast %17 : vector<1x128xf32> to vector<8x128xf32>
    %19 = arith.addf %16, %18 : vector<8x128xf32>
    %cst_17 = arith.constant 0.000000e+00 : f32
    %20 = vector.broadcast %cst_17 : f32 to vector<8x128xf32>
    %21 = arith.maximumf %19, %20 : vector<8x128xf32>
    %cst_18 = arith.constant 4.000000e-01 : f32
    %22 = vector.broadcast %cst_18 : f32 to vector<8x128xf32>
    %23 = arith.mulf %0, %22 : vector<8x128xf32>
    %24 = arith.addf %21, %23 : vector<8x128xf32>
    %c0_19 = arith.constant 0 : index
    %c0_20 = arith.constant 0 : index
    %25 = vector.load %arg8[%c0_19, %c0_20] : memref<8x128xf32, #tpu.memory_space<vmem>>, vector<8x128xf32>
    tpu.vector_store %arg8[%c0_19, %c0_20], %24 {strides = array<i32>} : memref<8x128xf32, #tpu.memory_space<vmem>>, vector<8x128xf32>,
    return
  }
  func.func @transform_0(%arg0: i32) -> (i32, i32) {
    %c0_i32 = arith.constant 0 : i32
    %c0_i32_0 = arith.constant 0 : i32
    return %arg0, %c0_i32 : i32, i32
  }
  func.func @transform_1(%arg0: i32) -> (i32, i32) {
    %c0_i32 = arith.constant 0 : i32
    %c0_i32_0 = arith.constant 0 : i32
    %c0_i32_1 = arith.constant 0 : i32
    return %c0_i32, %c0_i32_0 : i32, i32
  }
  func.func @transform_2(%arg0: i32) -> (i32, i32) {
    %c0_i32 = arith.constant 0 : i32
    %c0_i32_0 = arith.constant 0 : i32
    %c0_i32_1 = arith.constant 0 : i32
    return %c0_i32, %c0_i32_0 : i32, i32
  }
  func.func @transform_3(%arg0: i32) -> (i32, i32) {
    %c0_i32 = arith.constant 0 : i32
    %c0_i32_0 = arith.constant 0 : i32
    %c0_i32_1 = arith.constant 0 : i32
    return %c0_i32, %c0_i32_0 : i32, i32
  }
  func.func @transform_4(%arg0: i32) -> (i32, i32) {
    %c0_i32 = arith.constant 0 : i32
    %c0_i32_0 = arith.constant 0 : i32
    %c0_i32_1 = arith.constant 0 : i32
    return %c0_i32, %c0_i32_0 : i32, i32
  }
  func.func @transform_5(%arg0: i32) -> (i32, i32) {
    %c0_i32 = arith.constant 0 : i32
    %c0_i32_0 = arith.constant 0 : i32
    %c0_i32_1 = arith.constant 0 : i32
    return %c0_i32, %c0_i32_0 : i32, i32
  }
  func.func @transform_6(%arg0: i32) -> (i32, i32) {
    %c0_i32 = arith.constant 0 : i32
    %c0_i32_0 = arith.constant 0 : i32
    %c0_i32_1 = arith.constant 0 : i32
    return %c0_i32, %c0_i32_0 : i32, i32
  }
  func.func @transform_7(%arg0: i32) -> (i32, i32) {
    %c0_i32 = arith.constant 0 : i32
    %c0_i32_0 = arith.constant 0 : i32
    return %arg0, %c0_i32 : i32, i32
  }
}

module attributes {stable_mosaic.version = 11 : i64} {
  func.func @adapter_kernel(%arg0: i32, %arg1: memref<8x128xf32, #tpu.memory_space<vmem>>, %arg2: memref<128x32xf32, #tpu.memory_space<vmem>>, %arg3: memref<1x32xf32, #tpu.memory_space<vmem>>, %arg4: memref<32x32xf32, #tpu.memory_space<vmem>>, %arg5: memref<1x32xf32, #tpu.memory_space<vmem>>, %arg6: memref<32x128xf32, #tpu.memory_space<vmem>>, %arg7: memref<1x128xf32, #tpu.memory_space<vmem>>, %arg8: memref<8x128xf32, #tpu.memory_space<vmem>>) attributes {dimension_semantics = [#tpu.dimension_semantics<parallel>], iteration_bounds = array<i64: 1>, scalar_prefetch = 0 : i64, scratch_operands = 0 : i64, tpu.core_type = #tpu.core_type<tc>, window_params = [{transform_indices = @transform_0, window_bounds = array<i64: 8, 128>}, {pipeline_mode = #tpu.pipeline_mode<synchronous>, transform_indices = @transform_1, window_bounds = array<i64: 128, 32>}, {pipeline_mode = #tpu.pipeline_mode<synchronous>, transform_indices = @transform_2, window_bounds = array<i64: 1, 32>}, {pipeline_mode = #tpu.pipeline_mode<synchronous>, transform_indices = @transform_3, window_bounds = array<i64: 32, 32>}, {pipeline_mode = #tpu.pipeline_mode<synchronous>, transform_indices = @transform_4, window_bounds = array<i64: 1, 32>}, {pipeline_mode = #tpu.pipeline_mode<synchronous>, transform_indices = @transform_5, window_bounds = array<i64: 32, 128>}, {pipeline_mode = #tpu.pipeline_mode<synchronous>, transform_indices = @transform_6, window_bounds = array<i64: 1, 128>}, {transform_indices = @transform_7, window_bounds = array<i64: 8, 128>}]} {
    %c0 = arith.constant 0 : index
    %c0_0 = arith.constant 0 : index
    %0 = vector.load %arg1[%c0, %c0_0] : memref<8x128xf32, #tpu.memory_space<vmem>>, vector<8x128xf32>
    %c0_1 = arith.constant 0 : index
    %c0_2 = arith.constant 0 : index
    %1 = vector.load %arg2[%c0_1, %c0_2] : memref<128x32xf32, #tpu.memory_space<vmem>>, vector<128x32xf32>
    %cst = arith.constant dense<0.000000e+00> : vector<8x32xf32>
    %2 = tpu.matmul %0, %1, %cst {dimension_numbers = #tpu.dot_dimension_numbers<[1], [0], [0], [1], [0, 0, 1, 1], [], []>} : vector<8x128xf32>, vector<128x32xf32>, vector<8x32xf32> -> vector<8x32xf32>
    %c0_3 = arith.constant 0 : index
    %c0_4 = arith.constant 0 : index
    %3 = vector.load %arg3[%c0_3, %c0_4] : memref<1x32xf32, #tpu.memory_space<vmem>>, vector<1x32xf32>
    %4 = vector.broadcast %3 : vector<1x32xf32> to vector<8x32xf32>
    %5 = arith.addf %2, %4 : vector<8x32xf32>
    %cst_5 = arith.constant 0.000000e+00 : f32
    %6 = vector.broadcast %cst_5 : f32 to vector<8x32xf32>
    %7 = arith.maximumf %5, %6 : vector<8x32xf32>
    %c0_6 = arith.constant 0 : index
    %c0_7 = arith.constant 0 : index
    %8 = vector.load %arg4[%c0_6, %c0_7] : memref<32x32xf32, #tpu.memory_space<vmem>>, vector<32x32xf32>
    %cst_8 = arith.constant dense<0.000000e+00> : vector<8x32xf32>
    %9 = tpu.matmul %7, %8, %cst_8 {dimension_numbers = #tpu.dot_dimension_numbers<[1], [0], [0], [1], [0, 0, 1, 1], [], []>} : vector<8x32xf32>, vector<32x32xf32>, vector<8x32xf32> -> vector<8x32xf32>
    %c0_9 = arith.constant 0 : index
    %c0_10 = arith.constant 0 : index
    %10 = vector.load %arg5[%c0_9, %c0_10] : memref<1x32xf32, #tpu.memory_space<vmem>>, vector<1x32xf32>
    %11 = vector.broadcast %10 : vector<1x32xf32> to vector<8x32xf32>
    %12 = arith.addf %9, %11 : vector<8x32xf32>
    %cst_11 = arith.constant 0.000000e+00 : f32
    %13 = vector.broadcast %cst_11 : f32 to vector<8x32xf32>
    %14 = arith.maximumf %12, %13 : vector<8x32xf32>
    %c0_12 = arith.constant 0 : index
    %c0_13 = arith.constant 0 : index
    %15 = vector.load %arg6[%c0_12, %c0_13] : memref<32x128xf32, #tpu.memory_space<vmem>>, vector<32x128xf32>
    %cst_14 = arith.constant dense<0.000000e+00> : vector<8x128xf32>
    %16 = tpu.matmul %14, %15, %cst_14 {dimension_numbers = #tpu.dot_dimension_numbers<[1], [0], [0], [1], [0, 0, 1, 1], [], []>} : vector<8x32xf32>, vector<32x128xf32>, vector<8x128xf32> -> vector<8x128xf32>
    %c0_15 = arith.constant 0 : index
    %c0_16 = arith.constant 0 : index
    %17 = vector.load %arg7[%c0_15, %c0_16] : memref<1x128xf32, #tpu.memory_space<vmem>>, vector<1x128xf32>
    %18 = vector.broadcast %17 : vector<1x128xf32> to vector<8x128xf32>
    %19 = arith.addf %16, %18 : vector<8x128xf32>
    %cst_17 = arith.constant 0.000000e+00 : f32
    %20 = vector.broadcast %cst_17 : f32 to vector<8x128xf32>
    %21 = arith.maximumf %19, %20 : vector<8x128xf32>
    %cst_18 = arith.constant 4.000000e-01 : f32
    %22 = vector.broadcast %cst_18 : f32 to vector<8x128xf32>
    %23 = arith.mulf %0, %22 : vector<8x128xf32>
    %24 = arith.addf %21, %23 : vector<8x128xf32>
    %c0_19 = arith.constant 0 : index
    %c0_20 = arith.constant 0 : index
    %25 = vector.load %arg8[%c0_19, %c0_20] : memref<8x128xf32, #tpu.memory_space<vmem>>, vector<8x128xf32>
    tpu.vector_store %arg8[%c0_19, %c0_20], %24 {strides = array<i32>} : memref<8x128xf32, #tpu.memory_space<vmem>>, vector<8x128xf32>,
    return
  }
  func.func @transform_0(%arg0: i32) -> (i32, i32) {
    %c0_i32 = arith.constant 0 : i32
    %c0_i32_0 = arith.constant 0 : i32
    return %arg0, %c0_i32 : i32, i32
  }
  func.func @transform_1(%arg0: i32) -> (i32, i32) {
    %c0_i32 = arith.constant 0 : i32
    %c0_i32_0 = arith.constant 0 : i32
    %c0_i32_1 = arith.constant 0 : i32
    return %c0_i32, %c0_i32_0 : i32, i32
  }
  func.func @transform_2(%arg0: i32) -> (i32, i32) {
    %c0_i32 = arith.constant 0 : i32
    %c0_i32_0 = arith.constant 0 : i32
    %c0_i32_1 = arith.constant 0 : i32
    return %c0_i32, %c0_i32_0 : i32, i32
  }
  func.func @transform_3(%arg0: i32) -> (i32, i32) {
    %c0_i32 = arith.constant 0 : i32
    %c0_i32_0 = arith.constant 0 : i32
    %c0_i32_1 = arith.constant 0 : i32
    return %c0_i32, %c0_i32_0 : i32, i32
  }
  func.func @transform_4(%arg0: i32) -> (i32, i32) {
    %c0_i32 = arith.constant 0 : i32
    %c0_i32_0 = arith.constant 0 : i32
    %c0_i32_1 = arith.constant 0 : i32
    return %c0_i32, %c0_i32_0 : i32, i32
  }
  func.func @transform_5(%arg0: i32) -> (i32, i32) {
    %c0_i32 = arith.constant 0 : i32
    %c0_i32_0 = arith.constant 0 : i32
    %c0_i32_1 = arith.constant 0 : i32
    return %c0_i32, %c0_i32_0 : i32, i32
  }
  func.func @transform_6(%arg0: i32) -> (i32, i32) {
    %c0_i32 = arith.constant 0 : i32
    %c0_i32_0 = arith.constant 0 : i32
    %c0_i32_1 = arith.constant 0 : i32
    return %c0_i32, %c0_i32_0 : i32, i32
  }
  func.func @transform_7(%arg0: i32) -> (i32, i32) {
    %c0_i32 = arith.constant 0 : i32
    %c0_i32_0 = arith.constant 0 : i32
    return %arg0, %c0_i32 : i32, i32
  }
}

</mosaic_0001>

<bundles_post_ra>
// kernel: tpu_custom_call.1
= control target key start
LH: loop header
LB: loop body
LE: loop exit
PB: predicated region body
PF: predicated region fallthrough
CT: control target
= control target key end

     0   :  { %12 = vsyncpa [#allocation3], 0  ;;  %s671_s0 = inlined_call_operand.hbm [shape: f32[8,128], index: 0, kind: input, shape index: {}, may-alias: {0,7}]   ;;  %s672_s1 = inlined_call_operand.vmem [shape: f32[128,32], index: 1, kind: input, shape index: {}]   ;;  %s673_s2 = inlined_call_operand.vmem [shape: f32[1,32], index: 2, kind: input, shape index: {}]   ;;  %s674_s3 = inlined_call_operand.vmem [shape: f32[32,32], index: 3, kind: input, shape index: {}]   ;;  %s675_s4 = inlined_call_operand.vmem [shape: f32[1,32], index: 4, kind: input, shape index: {}]   ;;  %s676_s5 = inlined_call_operand.vmem [shape: f32[32,128], index: 5, kind: input, shape index: {}]   ;;  %s677_s6 = inlined_call_operand.vmem [shape: f32[1,128], index: 6, kind: input, shape index: {}]   ;;  %s678_s7 = inlined_call_operand.hbm [shape: f32[8,128], index: 7, kind: output, shape index: {}, may-alias: {0,7}]  }
   0x1   :  { %13 = vsyncpa [#allocation4], 0  ;;  %s501_s24 = smov [#allocation2]   ;;  %s453_s28 = scalar_lea.hbm %s671_s0, 128 }
   0x2   :  { %s20_s25 = sshll.u32 %s501_s24, 4  ;;  %p454_p0 = scmp.ne.s32.totalorder %s671_s0, %s453_s28  ;;  %s21_s25 = int_to_ptr.vmem [resolvable:$true] %s20_s25 }
   0x3   :  { %p457_p1 = scmp.lt.u32.totalorder %s453_s28, %s671_s0 }
   0x5   :  { %p459_p2 = pnand %p457_p1, %p454_p0 }
   0x7   :  { %462 = shalt.err (!%p459_p2)
}
   0x8   :  { %s463_s10 = scalar_lea.vmem %s21_s25, 128  ;;  %p468_p4 = scmp.lt.s32.totalorder %s21_s25, %s21_s25 }
   0x9   :  { %p464_p3 = scmp.ne.s32.totalorder %s21_s25, %s463_s10  ;;  %p469_p5 = scmp.lt.s32.totalorder %s463_s10, %s463_s10 }
   0xb   :  { %p470_p6 = por %p469_p5, %p468_p4 }
   0xd   :  { %p471_p7 = pnand %p470_p6, %p464_p3 }
   0xf   :  { %474 = shalt.err (!%p471_p7)
}
  0x10   :  { %23 = dma.hbm_to_vmem [thread:$0]  %s671_s0, 128, %s21_s25, [#allocation3]  }
  0x11   :  { %497 = dma.done.wait [#allocation3], 128  }
  0x12   :  { %498 = vsyncadd [#allocation3], 4294967168  ;;  %v502_v0 = vmov 0.0|0.0   ;;  %vm503_vm0 = vmmov 0   ;;  %v504_v1 = vmov 0.0   ;;  %v40_v2 = vld [vmem:[%s672_s1] sm:$0xff] }
  0x13   :  { %412 = vmatprep.subr.bf16.mxu0 %v502_v0  ;;  %387 = vmatprep.mubr.msk.f32.mxu0 %vm503_vm0, %v504_v1  ;;  %v41_v3 = vld [vmem:[%s672_s1 + $0x8] sm:$0xff]  ;;  %v42_v4 = vld [vmem:[%s672_s1 + $0x10] sm:$0xff]  ;;  %v43_v6 = vld [vmem:[%s672_s1 + $0x18] sm:$0xff]  ;;  %vm145_vm1 = vcmask 261120  }
  0x14   :  { %436 = vmatprep.subr.bf16.mxu1 %v502_v0  ;;  %398 = vmatprep.mubr.msk.f32.mxu1 %vm503_vm0, %v504_v1  ;;  %v413_v5 = vpack.c.bf16 %v41_v3, %v40_v2  ;;  %v416_v7 = vpack.c.bf16 %v43_v6, %v42_v4  ;;  %v44_v8 = vld [vmem:[%s672_s1 + $0x20] sm:$0xff]  ;;  %v45_v9 = vld [vmem:[%s672_s1 + $0x28] sm:$0xff]  ;;  %v46_v14 = vld [vmem:[%s672_s1 + $0x30] sm:$0xff] }
  0x15   :  { %v134_v10 = vld [vmem:[%s674_s3] sm:$0xff]  ;;  %v135_v11 = vld [vmem:[%s674_s3 + $0x8] sm:$0xff]  ;;  %v419_v12 = vpack.c.bf16 %v45_v9, %v44_v8  ;;  %v47_v15 = vld [vmem:[%s672_s1 + $0x38] sm:$0xff] }
  0x16   :  { %414 = vmatpush3.bf16.msra.mxu0 %v413_v5  ;;  %v437_v13 = vpack.c.bf16 %v135_v11, %v134_v10  ;;  %v422_v16 = vpack.c.bf16 %v47_v15, %v46_v14  ;;  %v48_v17 = vld [vmem:[%s672_s1 + $0x40] sm:$0xff]  ;;  %v49_v18 = vld [vmem:[%s672_s1 + $0x48] sm:$0xff]  ;;  %v50_v20 = vld [vmem:[%s672_s1 + $0x50] sm:$0xff] }
  0x17   :  { %415 = vmatprep.subr.bf16.mxu0 %v502_v0  ;;  %v425_v19 = vpack.c.bf16 %v49_v18, %v48_v17  ;;  %v51_v21 = vld [vmem:[%s672_s1 + $0x58] sm:$0xff]  ;;  %v52_v23 = vld [vmem:[%s672_s1 + $0x60] sm:$0xff]  ;;  %v53_v24 = vld [vmem:[%s672_s1 + $0x68] sm:$0xff] }
  0x18   :  { %438 = vmatpush3.bf16.msra.mxu1 %v437_v13  ;;  %v428_v22 = vpack.c.bf16 %v51_v21, %v50_v20  ;;  %v431_v25 = vpack.c.bf16 %v53_v24, %v52_v23  ;;  %v54_v26 = vld [vmem:[%s672_s1 + $0x70] sm:$0xff]  ;;  %v55_v27 = vld [vmem:[%s672_s1 + $0x78] sm:$0xff]  ;;  %v39_v29 = vld [vmem:[#allocation2] sm:$0xff] }
  0x19   :  { %439 = vmatprep.subr.bf16.mxu1 %v502_v0  ;;  %v434_v28 = vpack.c.bf16 %v55_v27, %v54_v26  ;;  %v136_v30 = vld [vmem:[%s674_s3 + $0x10] sm:$0xff]  ;;  %v137_v31 = vld [vmem:[%s674_s3 + $0x18] sm:$0xff]  ;;  %v323_v33 = vld [vmem:[%s673_s2] ss:$0 sm:$0xff]  ;;  %v305_v51 = vmul.f32 0.4, %v39_v29 }
  0x1a   :  { %417 = vmatpush3.bf16.msra.mxu0 %v416_v7  ;;  %v440_v32 = vpack.c.bf16 %v137_v31, %v136_v30  ;;  %v220_v34 = vld [vmem:[%s676_s5] sm:$0xff]  ;;  %v221_v35 = vld [vmem:[%s676_s5 + $0x8] sm:$0xff]  ;;  %v222_v41 = vld [vmem:[%s676_s5 + $0x10] sm:$0xff] }
  0x1b   :  { %418 = vmatprep.subr.bf16.mxu0 %v502_v0  ;;  %v443_v39 = vpack.c.bf16 %v221_v35, %v220_v34  ;;  %v223_v42 = vld [vmem:[%s676_s5 + $0x18] sm:$0xff]  ;;  %v324_v44 = vld [vmem:[%s675_s4] ss:$0 sm:$0xff]  ;;  %s505_s5 = smov [#allocation5]  }
  0x1c   :  { %441 = vmatpush3.bf16.msra.mxu1 %v440_v32  ;;  %v446_v43 = vpack.c.bf16 %v223_v42, %v222_v41  ;;  %v326_v49 = vld [vmem:[%s677_s6] ss:$0 sm:$0xff]  ;;  %s314_s15 = sshll.u32 %s505_s5, 4  ;;  %s315_s15 = int_to_ptr.vmem [resolvable:$true] %s314_s15 }
  0x1d   :  { %442 = vmatprep.subr.bf16.mxu1 %v502_v0  ;;  %s475_s4 = scalar_lea.vmem %s315_s15, 128  ;;  %p480_p9 = scmp.lt.s32.totalorder %s315_s15, %s315_s15 }
  0x1e   :  { %420 = vmatpush3.bf16.msra.mxu0 %v419_v12  ;;  %p476_p8 = scmp.ne.s32.totalorder %s315_s15, %s475_s4  ;;  %p481_p10 = scmp.lt.s32.totalorder %s475_s4, %s475_s4 }
  0x1f   :  { %421 = vmatprep.subr.bf16.mxu0 %v502_v0 }
  0x20   :  { %p482_p11 = por %p481_p10, %p480_p9 }
  0x22   :  { %423 = vmatpush3.bf16.msra.mxu0 %v422_v16  ;;  %p483_p12 = pnand %p482_p11, %p476_p8 }
  0x23   :  { %424 = vmatprep.subr.bf16.mxu0 %v502_v0 }
  0x26   :  { %426 = vmatpush3.bf16.msra.mxu0 %v425_v19 }
  0x27   :  { %427 = vmatprep.subr.bf16.mxu0 %v502_v0 }
  0x2a   :  { %429 = vmatpush3.bf16.msra.mxu0 %v428_v22 }
  0x2b   :  { %430 = vmatprep.subr.bf16.mxu0 %v502_v0 }
  0x2e   :  { %432 = vmatpush3.bf16.msra.mxu0 %v431_v25 }
  0x2f   :  { %433 = vmatprep.subr.bf16.mxu0 %v502_v0 }
  0x32   :  { %435 = vmatpush3.bf16.msra.mxu0 %v434_v28 }
  0x35   :  { %388 = vmatmul.mubr.f32.vlgmr.msra.gmra.mrb[0].mxu0 %v39_v29 }
 0x108   :  { %v129_v36 = vpop.f32.mrb[0].mxu0 }
 0x109   :  { %v130_v37 = vadd.f32 %v323_v33, %v129_v36  ;;  %v389_v38 = vpop.f32.mrb[1].mxu0 }
 0x10b   :  { %v133_v40 = vmax.f32 %v130_v37, 0.0 }
 0x10d   :  { %399 = vmatmul.mubr.msk.f32.vlgmr.msra.gmra.mrb[0].mxu1 %vm145_vm1, %v133_v40 }
 0x10e   :  { %444 = vmatpush3.bf16.msra.mxu1 %v443_v39  ;;  %409 = vmatprep.mubr.msk.f32.mxu1 %vm503_vm0, %v504_v1 }
 0x10f   :  { %445 = vmatprep.subr.bf16.mxu1 %v502_v0 }
 0x112   :  { %447 = vmatpush3.bf16.msra.mxu1 %v446_v43 }
 0x1e0   :  { %v215_v45 = vpop.f32.mrb[0].mxu1 }
 0x1e1   :  { %v216_v46 = vadd.f32 %v324_v44, %v215_v45  ;;  %v400_v47 = vpop.f32.mrb[1].mxu1 }
 0x1e3   :  { %v219_v48 = vmax.f32 %v216_v46, 0.0 }
 0x1e5   :  { %410 = vmatmul.mubr.msk.f32.vlgmr.msra.gmra.mrb[2].mxu1 %vm145_vm1, %v219_v48 }
 0x2b8   :  { %v300_v50 = vpop.f32.mrb[2].mxu1 }
 0x2b9   :  { %v301_v52 = vadd.f32 %v326_v49, %v300_v50  ;;  %v411_v53 = vpop.f32.mrb[3].mxu1 }
 0x2bb   :  { %v304_v54 = vmax.f32 %v301_v52, 0.0 }
 0x2bd   :  { %v306_v55 = vadd.f32 %v305_v51, %v304_v54 }
 0x2bf   :  { %307 = vst [vmem:[#allocation5] sm:$0xff] %v306_v55 }
 0x2c0   :  { %486 = shalt.err (!%p483_p12)
}
 0x2c1   :  { %s487_s6 = scalar_lea.hbm %s678_s7, 128 }
 0x2c2   :  { %p488_p13 = scmp.ne.s32.totalorder %s678_s7, %s487_s6  ;;  %p491_p0 = scmp.lt.u32.totalorder %s487_s6, %s678_s7 }
 0x2c4   :  { %p493_p1 = pnand %p491_p0, %p488_p13 }
 0x2c6   :  { %496 = shalt.err (!%p493_p1)
}
 0x2c7   :  { %317 = dma.vmem_to_hbm [thread:$0]  %s315_s15, 128, %s678_s7, [#allocation4]  }
 0x2c8   :  { %499 = dma.done.wait [#allocation4], 128  }
 0x2c9   :  { %500 = vsyncadd [#allocation4], 4294967168 }
 0x2ca   :  { %321 = vsyncpa [#allocation3], 1 }
 0x2cb   :  { %322 = vsyncpa [#allocation4], 1 }

// kernel: tpu_custom_call.1
= control target key start
LH: loop header
LB: loop body
LE: loop exit
PB: predicated region body
PF: predicated region fallthrough
CT: control target
= control target key end

     0   :  { %12 = vsyncpa [#allocation3], 0  ;;  %s671_s0 = inlined_call_operand.hbm [shape: f32[8,128], index: 0, kind: input, shape index: {}, may-alias: {0,7}]   ;;  %s672_s1 = inlined_call_operand.vmem [shape: f32[128,32], index: 1, kind: input, shape index: {}]   ;;  %s673_s2 = inlined_call_operand.vmem [shape: f32[1,32], index: 2, kind: input, shape index: {}]   ;;  %s674_s3 = inlined_call_operand.vmem [shape: f32[32,32], index: 3, kind: input, shape index: {}]   ;;  %s675_s4 = inlined_call_operand.vmem [shape: f32[1,32], index: 4, kind: input, shape index: {}]   ;;  %s676_s5 = inlined_call_operand.vmem [shape: f32[32,128], index: 5, kind: input, shape index: {}]   ;;  %s677_s6 = inlined_call_operand.vmem [shape: f32[1,128], index: 6, kind: input, shape index: {}]   ;;  %s678_s7 = inlined_call_operand.hbm [shape: f32[8,128], index: 7, kind: output, shape index: {}, may-alias: {0,7}]  }
   0x1   :  { %13 = vsyncpa [#allocation4], 0  ;;  %s501_s24 = smov [#allocation2]   ;;  %s453_s28 = scalar_lea.hbm %s671_s0, 128 }
   0x2   :  { %s20_s25 = sshll.u32 %s501_s24, 4  ;;  %p454_p0 = scmp.ne.s32.totalorder %s671_s0, %s453_s28  ;;  %s21_s25 = int_to_ptr.vmem [resolvable:$true] %s20_s25 }
   0x3   :  { %p457_p1 = scmp.lt.u32.totalorder %s453_s28, %s671_s0 }
   0x5   :  { %p459_p2 = pnand %p457_p1, %p454_p0 }
   0x7   :  { %462 = shalt.err (!%p459_p2)
}
   0x8   :  { %s463_s10 = scalar_lea.vmem %s21_s25, 128  ;;  %p468_p4 = scmp.lt.s32.totalorder %s21_s25, %s21_s25 }
   0x9   :  { %p464_p3 = scmp.ne.s32.totalorder %s21_s25, %s463_s10  ;;  %p469_p5 = scmp.lt.s32.totalorder %s463_s10, %s463_s10 }
   0xb   :  { %p470_p6 = por %p469_p5, %p468_p4 }
   0xd   :  { %p471_p7 = pnand %p470_p6, %p464_p3 }
   0xf   :  { %474 = shalt.err (!%p471_p7)
}
  0x10   :  { %23 = dma.hbm_to_vmem [thread:$0]  %s671_s0, 128, %s21_s25, [#allocation3]  }
  0x11   :  { %497 = dma.done.wait [#allocation3], 128  }
  0x12   :  { %498 = vsyncadd [#allocation3], 4294967168  ;;  %v502_v0 = vmov 0.0|0.0   ;;  %vm503_vm0 = vmmov 0   ;;  %v504_v1 = vmov 0.0   ;;  %v40_v2 = vld [vmem:[%s672_s1] sm:$0xff] }
  0x13   :  { %412 = vmatprep.subr.bf16.mxu0 %v502_v0  ;;  %387 = vmatprep.mubr.msk.f32.mxu0 %vm503_vm0, %v504_v1  ;;  %v41_v3 = vld [vmem:[%s672_s1 + $0x8] sm:$0xff]  ;;  %v42_v4 = vld [vmem:[%s672_s1 + $0x10] sm:$0xff]  ;;  %v43_v6 = vld [vmem:[%s672_s1 + $0x18] sm:$0xff]  ;;  %vm145_vm1 = vcmask 261120  }
  0x14   :  { %436 = vmatprep.subr.bf16.mxu1 %v502_v0  ;;  %398 = vmatprep.mubr.msk.f32.mxu1 %vm503_vm0, %v504_v1  ;;  %v413_v5 = vpack.c.bf16 %v41_v3, %v40_v2  ;;  %v416_v7 = vpack.c.bf16 %v43_v6, %v42_v4  ;;  %v44_v8 = vld [vmem:[%s672_s1 + $0x20] sm:$0xff]  ;;  %v45_v9 = vld [vmem:[%s672_s1 + $0x28] sm:$0xff]  ;;  %v46_v14 = vld [vmem:[%s672_s1 + $0x30] sm:$0xff] }
  0x15   :  { %v134_v10 = vld [vmem:[%s674_s3] sm:$0xff]  ;;  %v135_v11 = vld [vmem:[%s674_s3 + $0x8] sm:$0xff]  ;;  %v419_v12 = vpack.c.bf16 %v45_v9, %v44_v8  ;;  %v47_v15 = vld [vmem:[%s672_s1 + $0x38] sm:$0xff] }
  0x16   :  { %414 = vmatpush3.bf16.msra.mxu0 %v413_v5  ;;  %v437_v13 = vpack.c.bf16 %v135_v11, %v134_v10  ;;  %v422_v16 = vpack.c.bf16 %v47_v15, %v46_v14  ;;  %v48_v17 = vld [vmem:[%s672_s1 + $0x40] sm:$0xff]  ;;  %v49_v18 = vld [vmem:[%s672_s1 + $0x48] sm:$0xff]  ;;  %v50_v20 = vld [vmem:[%s672_s1 + $0x50] sm:$0xff] }
  0x17   :  { %415 = vmatprep.subr.bf16.mxu0 %v502_v0  ;;  %v425_v19 = vpack.c.bf16 %v49_v18, %v48_v17  ;;  %v51_v21 = vld [vmem:[%s672_s1 + $0x58] sm:$0xff]  ;;  %v52_v23 = vld [vmem:[%s672_s1 + $0x60] sm:$0xff]  ;;  %v53_v24 = vld [vmem:[%s672_s1 + $0x68] sm:$0xff] }
  0x18   :  { %438 = vmatpush3.bf16.msra.mxu1 %v437_v13  ;;  %v428_v22 = vpack.c.bf16 %v51_v21, %v50_v20  ;;  %v431_v25 = vpack.c.bf16 %v53_v24, %v52_v23  ;;  %v54_v26 = vld [vmem:[%s672_s1 + $0x70] sm:$0xff]  ;;  %v55_v27 = vld [vmem:[%s672_s1 + $0x78] sm:$0xff]  ;;  %v39_v29 = vld [vmem:[#allocation2] sm:$0xff] }
  0x19   :  { %439 = vmatprep.subr.bf16.mxu1 %v502_v0  ;;  %v434_v28 = vpack.c.bf16 %v55_v27, %v54_v26  ;;  %v136_v30 = vld [vmem:[%s674_s3 + $0x10] sm:$0xff]  ;;  %v137_v31 = vld [vmem:[%s674_s3 + $0x18] sm:$0xff]  ;;  %v323_v33 = vld [vmem:[%s673_s2] ss:$0 sm:$0xff]  ;;  %v305_v51 = vmul.f32 0.4, %v39_v29 }
  0x1a   :  { %417 = vmatpush3.bf16.msra.mxu0 %v416_v7  ;;  %v440_v32 = vpack.c.bf16 %v137_v31, %v136_v30  ;;  %v220_v34 = vld [vmem:[%s676_s5] sm:$0xff]  ;;  %v221_v35 = vld [vmem:[%s676_s5 + $0x8] sm:$0xff]  ;;  %v222_v41 = vld [vmem:[%s676_s5 + $0x10] sm:$0xff] }
  0x1b   :  { %418 = vmatprep.subr.bf16.mxu0 %v502_v0  ;;  %v443_v39 = vpack.c.bf16 %v221_v35, %v220_v34  ;;  %v223_v42 = vld [vmem:[%s676_s5 + $0x18] sm:$0xff]  ;;  %v324_v44 = vld [vmem:[%s675_s4] ss:$0 sm:$0xff]  ;;  %s505_s5 = smov [#allocation5]  }
  0x1c   :  { %441 = vmatpush3.bf16.msra.mxu1 %v440_v32  ;;  %v446_v43 = vpack.c.bf16 %v223_v42, %v222_v41  ;;  %v326_v49 = vld [vmem:[%s677_s6] ss:$0 sm:$0xff]  ;;  %s314_s15 = sshll.u32 %s505_s5, 4  ;;  %s315_s15 = int_to_ptr.vmem [resolvable:$true] %s314_s15 }
  0x1d   :  { %442 = vmatprep.subr.bf16.mxu1 %v502_v0  ;;  %s475_s4 = scalar_lea.vmem %s315_s15, 128  ;;  %p480_p9 = scmp.lt.s32.totalorder %s315_s15, %s315_s15 }
  0x1e   :  { %420 = vmatpush3.bf16.msra.mxu0 %v419_v12  ;;  %p476_p8 = scmp.ne.s32.totalorder %s315_s15, %s475_s4  ;;  %p481_p10 = scmp.lt.s32.totalorder %s475_s4, %s475_s4 }
  0x1f   :  { %421 = vmatprep.subr.bf16.mxu0 %v502_v0 }
  0x20   :  { %p482_p11 = por %p481_p10, %p480_p9 }
  0x22   :  { %423 = vmatpush3.bf16.msra.mxu0 %v422_v16  ;;  %p483_p12 = pnand %p482_p11, %p476_p8 }
  0x23   :  { %424 = vmatprep.subr.bf16.mxu0 %v502_v0 }
  0x26   :  { %426 = vmatpush3.bf16.msra.mxu0 %v425_v19 }
  0x27   :  { %427 = vmatprep.subr.bf16.mxu0 %v502_v0 }
  0x2a   :  { %429 = vmatpush3.bf16.msra.mxu0 %v428_v22 }
  0x2b   :  { %430 = vmatprep.subr.bf16.mxu0 %v502_v0 }
  0x2e   :  { %432 = vmatpush3.bf16.msra.mxu0 %v431_v25 }
  0x2f   :  { %433 = vmatprep.subr.bf16.mxu0 %v502_v0 }
  0x32   :  { %435 = vmatpush3.bf16.msra.mxu0 %v434_v28 }
  0x35   :  { %388 = vmatmul.mubr.f32.vlgmr.msra.gmra.mrb[0].mxu0 %v39_v29 }
 0x108   :  { %v129_v36 = vpop.f32.mrb[0].mxu0 }
 0x109   :  { %v130_v37 = vadd.f32 %v323_v33, %v129_v36  ;;  %v389_v38 = vpop.f32.mrb[1].mxu0 }
 0x10b   :  { %v133_v40 = vmax.f32 %v130_v37, 0.0 }
 0x10d   :  { %399 = vmatmul.mubr.msk.f32.vlgmr.msra.gmra.mrb[0].mxu1 %vm145_vm1, %v133_v40 }
 0x10e   :  { %444 = vmatpush3.bf16.msra.mxu1 %v443_v39  ;;  %409 = vmatprep.mubr.msk.f32.mxu1 %vm503_vm0, %v504_v1 }
 0x10f   :  { %445 = vmatprep.subr.bf16.mxu1 %v502_v0 }
 0x112   :  { %447 = vmatpush3.bf16.msra.mxu1 %v446_v43 }
 0x1e0   :  { %v215_v45 = vpop.f32.mrb[0].mxu1 }
 0x1e1   :  { %v216_v46 = vadd.f32 %v324_v44, %v215_v45  ;;  %v400_v47 = vpop.f32.mrb[1].mxu1 }
 0x1e3   :  { %v219_v48 = vmax.f32 %v216_v46, 0.0 }
 0x1e5   :  { %410 = vmatmul.mubr.msk.f32.vlgmr.msra.gmra.mrb[2].mxu1 %vm145_vm1, %v219_v48 }
 0x2b8   :  { %v300_v50 = vpop.f32.mrb[2].mxu1 }
 0x2b9   :  { %v301_v52 = vadd.f32 %v326_v49, %v300_v50  ;;  %v411_v53 = vpop.f32.mrb[3].mxu1 }
 0x2bb   :  { %v304_v54 = vmax.f32 %v301_v52, 0.0 }
 0x2bd   :  { %v306_v55 = vadd.f32 %v305_v51, %v304_v54 }
 0x2bf   :  { %307 = vst [vmem:[#allocation5] sm:$0xff] %v306_v55 }
 0x2c0   :  { %486 = shalt.err (!%p483_p12)
}
 0x2c1   :  { %s487_s6 = scalar_lea.hbm %s678_s7, 128 }
 0x2c2   :  { %p488_p13 = scmp.ne.s32.totalorder %s678_s7, %s487_s6  ;;  %p491_p0 = scmp.lt.u32.totalorder %s487_s6, %s678_s7 }
 0x2c4   :  { %p493_p1 = pnand %p491_p0, %p488_p13 }
 0x2c6   :  { %496 = shalt.err (!%p493_p1)
}
 0x2c7   :  { %317 = dma.vmem_to_hbm [thread:$0]  %s315_s15, 128, %s678_s7, [#allocation4]  }
 0x2c8   :  { %499 = dma.done.wait [#allocation4], 128  }
 0x2c9   :  { %500 = vsyncadd [#allocation4], 4294967168 }
 0x2ca   :  { %321 = vsyncpa [#allocation3], 1 }
 0x2cb   :  { %322 = vsyncpa [#allocation4], 1 }

</bundles_post_ra>
